<compile_context>
chip_gen: v7x
topology: tpu7x:2x2x1
jax: 0.10.0
libtpu: 0.0.40
codegen_flags: <defaults>
</compile_context>

<pallas_src>
import functools

import jax
import jax.numpy as jnp
from jax.experimental import pallas as pl
from jax.experimental.pallas import tpu as pltpu


def _round_up(x, m):
    return ((x + m - 1) // m) * m


def _pick_tb(batch):
    """Batch tile: multiple of 8, >=2 grid steps when possible, capped at 256."""
    if batch <= 8:
        return 8
    half = -(-batch // 2)              # ceil(B / 2) -> at least 2 grid steps
    return min(_round_up(half, 8), 256)


def _make_fused_kernel(n_layers):
    """Kernel: refs = (x, w0, b0, w1, b1, ..., w_{L-1}, b_{L-1}, out)."""

    def kernel(*refs):
        x_ref = refs[0]
        o_ref = refs[-1]
        h = x_ref[...]                                    # (TB, Din) f32
        for l in range(n_layers):
            w_ref = refs[1 + 2 * l]                       # (Din_p, Dout_p) bf16
            b_ref = refs[2 + 2 * l]                       # (1, Dout_p)     f32
            y = jnp.dot(h.astype(jnp.bfloat16), w_ref[...],
                        preferred_element_type=jnp.float32)
            y = y + b_ref[...]                            # broadcast over batch
            h = jnp.maximum(y, 0.0)                       # ReLU on f32 accumulator
        o_ref[...] = h.astype(o_ref.dtype)

    return kernel


def init_encoder_params(key, data_dim, compress_dims, embedding_dim):
    """PyTorch-Linear-like init U(-1/sqrt(fan_in), +), plus padded bf16 copies.

    Returns (padded_params, ref_params, embedding_dim):
      padded_params: list of (w_pad_bf16, b_pad_f32); output dims padded to a
                     multiple of 128 (zero pad), bias stored as (1, Dout_pad).
      ref_params:    list of (w, b) unpadded f32, for the pure-JAX reference.
    """
    dims = [data_dim] + list(compress_dims) + [embedding_dim]
    padded, ref = [], []
    d_in_pad = data_dim   # first layer consumes the unpadded input width
    # TODO(synk): callers with a data_dim not aligned to 16 pay a small relayout
    # on the first dot; we deliberately avoid a wrapper-side pad of x (HBM copy).
    for d_in, d_out in zip(dims[:-1], dims[1:]):
        key, kw, kb = jax.random.split(key, 3)
        bound = 1.0 / float(d_in) ** 0.5
        w = jax.random.uniform(kw, (d_in, d_out), jnp.float32, -bound, bound)
        b = jax.random.uniform(kb, (d_out,), jnp.float32, -bound, bound)
        ref.append((w, b))

        d_out_pad = _round_up(d_out, 128)
        w_pad = jnp.zeros((d_in_pad, d_out_pad), jnp.float32)
        w_pad = w_pad.at[:d_in, :d_out].set(w)
        w_pad = w_pad.astype(jnp.bfloat16)   # bf16 MXU operand; zero pad exact
        b_pad = jnp.zeros((1, d_out_pad), jnp.float32).at[0, :d_out].set(b)
        padded.append((w_pad, b_pad))
        d_in_pad = d_out_pad                 # next layer's input is padded width
    return padded, ref, embedding_dim


@functools.partial(jax.jit, static_argnums=(2,))
def _encoder_pallas(x, padded_flat, meta):
    """One fused pallas_call over the whole layer stack.

    meta = (n_layers, w_shapes, embedding_dim); padded_flat = (w0, b0, w1, b1, ...).
    """
    n_layers, w_shapes, embedding_dim = meta
    B, Din = x.shape

    tb = _pick_tb(B)
    grid = (pl.cdiv(B, tb),)            # ragged last block handled by Pallas
    dout_last = w_shapes[-1][1]

    in_specs = [pl.BlockSpec((tb, Din), lambda i: (i, 0))]
    for (din_p, dout_p) in w_shapes:
        in_specs.append(pl.BlockSpec((din_p, dout_p), lambda i: (0, 0)))
        in_specs.append(pl.BlockSpec((1, dout_p), lambda i: (0, 0)))
    out_spec = pl.BlockSpec((tb, dout_last), lambda i: (i, 0))

    # VMEM budget: double-buffered x/out tiles + (double-buffered) weights/biases
    # + a few live f32 activation tiles, with 2x headroom.  Explicit limit matters
    # most on v5e (16 MiB default); capped well under v7x's 64 MiB physical VMEM.
    max_dout = max(do for _, do in w_shapes)
    x_tile = tb * Din * 4
    out_tile = tb * dout_last * 4
    w_bytes = sum(di * do * 2 for di, do in w_shapes)      # bf16
    b_bytes = sum(do * 4 for _, do in w_shapes)
    act_bytes = 3 * tb * max_dout * 4
    needed = 2 * (x_tile + out_tile + w_bytes + b_bytes) + act_bytes
    vmem_limit = int(min(48 * 1024 * 1024, max(2 * needed, 16 * 1024 * 1024)))

    flops = 2 * B * sum(di * do for di, do in w_shapes)
    bytes_accessed = B * Din * 4 + B * dout_last * 4 + w_bytes + b_bytes

    out = pl.pallas_call(
        _make_fused_kernel(n_layers),
        out_shape=jax.ShapeDtypeStruct((B, dout_last), jnp.float32),
        grid=grid,
        in_specs=in_specs,
        out_specs=out_spec,
        compiler_params=pltpu.CompilerParams(
            dimension_semantics=("parallel",),
            vmem_limit_bytes=vmem_limit,
        ),
        cost_estimate=pl.CostEstimate(
            flops=flops, transcendentals=0, bytes_accessed=bytes_accessed),
    )(x, *padded_flat)

    return out[:, :embedding_dim]


def encoder_forward(padded_params, embedding_dim, x):
    """Pallas implementation of Encoder.forward (fused Linear+ReLU stack)."""
    n_layers = len(padded_params)
    w_shapes = tuple(tuple(w.shape) for w, _ in padded_params)
    flat = tuple(t for wb in padded_params for t in wb)
    meta = (n_layers, w_shapes, embedding_dim)
    return _encoder_pallas(x, flat, meta)


def encoder_forward_ref(ref_params, x):
    """Pure-f32 JAX reference (true module semantics)."""
    h = x
    for w, b in ref_params:
        h = jnp.maximum(h @ w + b, 0.0)
    return h


def encoder_forward_ref_bf16(ref_params, x):
    """Reference emulating bf16 MXU operands with f32 accumulation."""
    h = x
    for w, b in ref_params:
        y = jnp.dot(h.astype(jnp.bfloat16), w.astype(jnp.bfloat16),
                    preferred_element_type=jnp.float32) + b
        h = jnp.maximum(y, 0.0)
    return h


if __name__ == "__main__":
    # Small shapes consistent with the module's forward.
    # batch=20 is deliberately NOT a tile multiple: exercises the ragged last
    # grid block (no wrapper-side jnp.pad) with grid=(2,) for dual-TC sharding.
    batch = 20
    data_dim = 32
    compress_dims = (64, 48)
    embedding_dim = 24

    key = jax.random.PRNGKey(0)
    key, kx = jax.random.split(key)
    x = jax.random.normal(kx, (batch, data_dim), dtype=jnp.float32)

    padded_params, ref_params, emb = init_encoder_params(
        key, data_dim, compress_dims, embedding_dim
    )

    out = jax.block_until_ready(encoder_forward(padded_params, emb, x))
    ref32 = jax.block_until_ready(encoder_forward_ref(ref_params, x))
    ref16 = jax.block_until_ready(encoder_forward_ref_bf16(ref_params, x))

    assert out.shape == (batch, embedding_dim), out.shape
    # Loose check vs pure-f32 module semantics (bf16 MXU operands in kernel).
    assert jnp.allclose(out, ref32, atol=3e-2, rtol=3e-2), "mismatch vs f32 reference"
    # Tight check vs a bf16-operand / f32-accumulate emulation of the kernel.
    assert jnp.allclose(out, ref16, atol=1e-3, rtol=1e-3), "mismatch vs bf16 reference"
    print("KERNEL_OK")
</pallas_src>

<mosaic_0001>
module attributes {stable_mosaic.version = 11 : i64} {
  func.func @kernel(%arg0: i32, %arg1: memref<16x32xf32, #tpu.memory_space<vmem>>, %arg2: memref<32x128xbf16, #tpu.memory_space<vmem>>, %arg3: memref<1x128xf32, #tpu.memory_space<vmem>>, %arg4: memref<128x128xbf16, #tpu.memory_space<vmem>>, %arg5: memref<1x128xf32, #tpu.memory_space<vmem>>, %arg6: memref<128x128xbf16, #tpu.memory_space<vmem>>, %arg7: memref<1x128xf32, #tpu.memory_space<vmem>>, %arg8: memref<16x128xf32, #tpu.memory_space<vmem>>) attributes {dimension_semantics = [#tpu.dimension_semantics<parallel>], iteration_bounds = array<i64: 2>, scalar_prefetch = 0 : i64, scratch_operands = 0 : i64, tpu.core_type = #tpu.core_type<tc>, window_params = [{transform_indices = @transform_0, window_bounds = array<i64: 16, 32>}, {pipeline_mode = #tpu.pipeline_mode<synchronous>, transform_indices = @transform_1, window_bounds = array<i64: 32, 128>}, {pipeline_mode = #tpu.pipeline_mode<synchronous>, transform_indices = @transform_2, window_bounds = array<i64: 1, 128>}, {pipeline_mode = #tpu.pipeline_mode<synchronous>, transform_indices = @transform_3, window_bounds = array<i64: 128, 128>}, {pipeline_mode = #tpu.pipeline_mode<synchronous>, transform_indices = @transform_4, window_bounds = array<i64: 1, 128>}, {pipeline_mode = #tpu.pipeline_mode<synchronous>, transform_indices = @transform_5, window_bounds = array<i64: 128, 128>}, {pipeline_mode = #tpu.pipeline_mode<synchronous>, transform_indices = @transform_6, window_bounds = array<i64: 1, 128>}, {transform_indices = @transform_7, window_bounds = array<i64: 16, 128>}]} {
    %c0 = arith.constant 0 : index
    %c0_0 = arith.constant 0 : index
    %0 = vector.load %arg1[%c0, %c0_0] : memref<16x32xf32, #tpu.memory_space<vmem>>, vector<16x32xf32>
    %1 = arith.truncf %0 : vector<16x32xf32> to vector<16x32xbf16>
    %c0_1 = arith.constant 0 : index
    %c0_2 = arith.constant 0 : index
    %2 = vector.load %arg2[%c0_1, %c0_2] : memref<32x128xbf16, #tpu.memory_space<vmem>>, vector<32x128xbf16>
    %cst = arith.constant dense<0.000000e+00> : vector<16x128xf32>
    %3 = tpu.matmul %1, %2, %cst {dimension_numbers = #tpu.dot_dimension_numbers<[1], [0], [0], [1], [0, 0, 1, 1], [], []>} : vector<16x32xbf16>, vector<32x128xbf16>, vector<16x128xf32> -> vector<16x128xf32>
    %c0_3 = arith.constant 0 : index
    %c0_4 = arith.constant 0 : index
    %4 = vector.load %arg3[%c0_3, %c0_4] : memref<1x128xf32, #tpu.memory_space<vmem>>, vector<1x128xf32>
    %5 = vector.broadcast %4 : vector<1x128xf32> to vector<16x128xf32>
    %6 = arith.addf %3, %5 : vector<16x128xf32>
    %cst_5 = arith.constant 0.000000e+00 : f32
    %7 = vector.broadcast %cst_5 : f32 to vector<16x128xf32>
    %8 = arith.maximumf %6, %7 : vector<16x128xf32>
    %9 = arith.truncf %8 : vector<16x128xf32> to vector<16x128xbf16>
    %c0_6 = arith.constant 0 : index
    %c0_7 = arith.constant 0 : index
    %10 = vector.load %arg4[%c0_6, %c0_7] : memref<128x128xbf16, #tpu.memory_space<vmem>>, vector<128x128xbf16>
    %cst_8 = arith.constant dense<0.000000e+00> : vector<16x128xf32>
    %11 = tpu.matmul %9, %10, %cst_8 {dimension_numbers = #tpu.dot_dimension_numbers<[1], [0], [0], [1], [0, 0, 1, 1], [], []>} : vector<16x128xbf16>, vector<128x128xbf16>, vector<16x128xf32> -> vector<16x128xf32>
    %c0_9 = arith.constant 0 : index
    %c0_10 = arith.constant 0 : index
    %12 = vector.load %arg5[%c0_9, %c0_10] : memref<1x128xf32, #tpu.memory_space<vmem>>, vector<1x128xf32>
    %13 = vector.broadcast %12 : vector<1x128xf32> to vector<16x128xf32>
    %14 = arith.addf %11, %13 : vector<16x128xf32>
    %cst_11 = arith.constant 0.000000e+00 : f32
    %15 = vector.broadcast %cst_11 : f32 to vector<16x128xf32>
    %16 = arith.maximumf %14, %15 : vector<16x128xf32>
    %17 = arith.truncf %16 : vector<16x128xf32> to vector<16x128xbf16>
    %c0_12 = arith.constant 0 : index
    %c0_13 = arith.constant 0 : index
    %18 = vector.load %arg6[%c0_12, %c0_13] : memref<128x128xbf16, #tpu.memory_space<vmem>>, vector<128x128xbf16>
    %cst_14 = arith.constant dense<0.000000e+00> : vector<16x128xf32>
    %19 = tpu.matmul %17, %18, %cst_14 {dimension_numbers = #tpu.dot_dimension_numbers<[1], [0], [0], [1], [0, 0, 1, 1], [], []>} : vector<16x128xbf16>, vector<128x128xbf16>, vector<16x128xf32> -> vector<16x128xf32>
    %c0_15 = arith.constant 0 : index
    %c0_16 = arith.constant 0 : index
    %20 = vector.load %arg7[%c0_15, %c0_16] : memref<1x128xf32, #tpu.memory_space<vmem>>, vector<1x128xf32>
    %21 = vector.broadcast %20 : vector<1x128xf32> to vector<16x128xf32>
    %22 = arith.addf %19, %21 : vector<16x128xf32>
    %cst_17 = arith.constant 0.000000e+00 : f32
    %23 = vector.broadcast %cst_17 : f32 to vector<16x128xf32>
    %24 = arith.maximumf %22, %23 : vector<16x128xf32>
    %c0_18 = arith.constant 0 : index
    %c0_19 = arith.constant 0 : index
    %25 = vector.load %arg8[%c0_18, %c0_19] : memref<16x128xf32, #tpu.memory_space<vmem>>, vector<16x128xf32>
    tpu.vector_store %arg8[%c0_18, %c0_19], %24 {strides = array<i32>} : memref<16x128xf32, #tpu.memory_space<vmem>>, vector<16x128xf32>,
    return
  }
  func.func @transform_0(%arg0: i32) -> (i32, i32) {
    %c0_i32 = arith.constant 0 : i32
    %c0_i32_0 = arith.constant 0 : i32
    return %arg0, %c0_i32 : i32, i32
  }
  func.func @transform_1(%arg0: i32) -> (i32, i32) {
    %c0_i32 = arith.constant 0 : i32
    %c0_i32_0 = arith.constant 0 : i32
    %c0_i32_1 = arith.constant 0 : i32
    return %c0_i32, %c0_i32_0 : i32, i32
  }
  func.func @transform_2(%arg0: i32) -> (i32, i32) {
    %c0_i32 = arith.constant 0 : i32
    %c0_i32_0 = arith.constant 0 : i32
    %c0_i32_1 = arith.constant 0 : i32
    return %c0_i32, %c0_i32_0 : i32, i32
  }
  func.func @transform_3(%arg0: i32) -> (i32, i32) {
    %c0_i32 = arith.constant 0 : i32
    %c0_i32_0 = arith.constant 0 : i32
    %c0_i32_1 = arith.constant 0 : i32
    return %c0_i32, %c0_i32_0 : i32, i32
  }
  func.func @transform_4(%arg0: i32) -> (i32, i32) {
    %c0_i32 = arith.constant 0 : i32
    %c0_i32_0 = arith.constant 0 : i32
    %c0_i32_1 = arith.constant 0 : i32
    return %c0_i32, %c0_i32_0 : i32, i32
  }
  func.func @transform_5(%arg0: i32) -> (i32, i32) {
    %c0_i32 = arith.constant 0 : i32
    %c0_i32_0 = arith.constant 0 : i32
    %c0_i32_1 = arith.constant 0 : i32
    return %c0_i32, %c0_i32_0 : i32, i32
  }
  func.func @transform_6(%arg0: i32) -> (i32, i32) {
    %c0_i32 = arith.constant 0 : i32
    %c0_i32_0 = arith.constant 0 : i32
    %c0_i32_1 = arith.constant 0 : i32
    return %c0_i32, %c0_i32_0 : i32, i32
  }
  func.func @transform_7(%arg0: i32) -> (i32, i32) {
    %c0_i32 = arith.constant 0 : i32
    %c0_i32_0 = arith.constant 0 : i32
    return %arg0, %c0_i32 : i32, i32
  }
}

</mosaic_0001>

<bundles_post_ra>
// kernel: _encoder_pallas.1
= control target key start
LH: loop header
LB: loop body
LE: loop exit
PB: predicated region body
PF: predicated region fallthrough
CT: control target
= control target key end

     0   :  { %s1556_s0 = inlined_call_operand.hbm [shape: f32[20,32], index: 0, kind: input, shape index: {}]   ;;  %s1557_s1 = inlined_call_operand.hbm [shape: bf16[32,128], index: 1, kind: input, shape index: {}]   ;;  %s1558_s2 = inlined_call_operand.vmem [shape: f32[1,128], index: 2, kind: input, shape index: {}]   ;;  %s1559_s3 = inlined_call_operand.hbm [shape: bf16[128,128], index: 3, kind: input, shape index: {}]   ;;  %s1560_s4 = inlined_call_operand.vmem [shape: f32[1,128], index: 4, kind: input, shape index: {}]   ;;  %s1561_s5 = inlined_call_operand.hbm [shape: bf16[128,128], index: 5, kind: input, shape index: {}]   ;;  %s1562_s6 = inlined_call_operand.vmem [shape: f32[1,128], index: 6, kind: input, shape index: {}]   ;;  %s1563_s7 = inlined_call_operand.hbm [shape: f32[20,128], index: 7, kind: output, shape index: {}]  }
   0x1   :  { %1571 = sst [smem:[#allocation19_spill]] %s1557_s1 }
   0x2   :  { %12 = vsyncpa [#allocation3], 0 }
   0x3   :  { %14 = vsyncpa [#allocation3 + $0x1], 0 }
   0x4   :  { %15 = vsyncpa [#allocation6], 0 }
   0x5   :  { %16 = vsyncpa [#allocation9], 0 }
   0x6   :  { %17 = vsyncpa [#allocation4], 0 }
   0x7   :  { %19 = vsyncpa [#allocation4 + $0x1], 0  ;;  %s1243_s24 = smov 0   ;;  %s1245_s25 = smov 0  }
   0x8   :  { %s1247_s26 = smov 0   ;;  %s1249_s27 = smov 0  }
   0x9 LB: > { %1572 = sst [smem:[#allocation15_spill]] %s1176_s24  ;;  %s1264_s28 = sadd.s32 4294967295, %s1188_s27   ;;  %s1188_s27 = sphi %s1249_s27, %s1595_s27   ;;  %s1184_s26 = sphi %s1247_s26, %s1599_s26   ;;  %s1180_s25 = sphi %s1245_s25, %s1598_s25   ;;  %s1176_s24 = sphi %s1243_s24, %s1597_s24  }
   0xa   : > { %s785_s29 = sadd.s32 4294967294, %s1188_s27   ;;  %s1268_s30 = sadd.s32 1, %s1188_s27  }
   0xb   : > { %1573 = sst [smem:[#allocation16_spill]] %s1268_s30  ;;  %s32_s8 = sadd.s32 1, %s1184_s26 }
   0xc   : > { %s29_s9 = ssub.s32 %s1188_s27, %s1268_s30  ;;  %p39_p0 = scmp.ne.s32.totalorder %s1184_s26, %s1180_s25 }
   0xd   : > { %p30_p1 = scmp.eq.s32.totalorder %s29_s9, 0  ;;  %p40_p2 = scmp.eq.s32.totalorder %s1188_s27, 0 }
   0xe   : > { %p45_p3 = scmp.ne.s32.totalorder %s1180_s25, %s1176_s24  ;;  %p1564_p4 = scmp.eq.s32.totalorder %s1264_s28, 0 }
   0xf   : > { %s1280_s10 = scalar_select %p30_p1, %s1184_s26, %s32_s8  }
  0x10   : > { %p1282_p5 = por %p40_p2, %p39_p0  ;;  %p1288_p6 = por %p1564_p4, %p45_p3 }
  0x11   : > { %1574 = sst [smem:[#allocation17_spill]] %s1280_s10  ;;  %p195_p7 = scmp.eq.s32.totalorder %s1264_s28, 1 }
  0x12   : > { %s1575_s11 = scalar_select %p1282_p5, 1, 0 }
  0x13   : > { %s1576_s12 = scalar_select %p1288_p6, 1, 0 }
  0x14   : > { %p201_p8 = scmp.eq.s32.totalorder %s785_s29, 1  ;;  %p786_p9 = scmp.ge.s32.totalorder %s1188_s27, 1 }
  0x15   : > { %p208_p10 = scmp.lt.s32.totalorder %s1188_s27, 3  ;;  %p1295_p11 = por %p195_p7, %p39_p0 }
  0x16   : > { %p1299_p12 = por %p201_p8, %p45_p3  ;;  %s1190_s16 = smov [#allocation5]  }
  0x17   : > { %s1577_s13 = scalar_select %p1295_p11, 1, 0 }
  0x18   : > { %s1578_s14 = scalar_select %p1299_p12, 1, 0 }
  0x19   : > { %p1303_p13 = pnand %p786_p9, %p208_p10  ;;  %s220_s17 = sshll.u32 %s1190_s16, 4  ;;  %s221_s17 = int_to_ptr.vmem [resolvable:$true] %s220_s17 }
  0x1a   : > { %1579 = sst [smem:[#allocation18_spill]] %s1578_s14  ;;  %s1191_s19 = smov [#allocation7]  }
  0x1b   : > { %s1580_s15 = scalar_select %p1303_p13, 1, 0 }
  0x1c   : > { %p920_p1 = pneg %p1303_p13  ;;  %s236_s20 = sshll.u32 %s1191_s19, 4  ;;  %s1315_s20 = int_to_ptr.vmem [resolvable:$true] %s236_s20 }
  0x1d   : > { %s1582_s1 = sld [smem:[#allocation19_spill]] }
  0x1e   : > { %p1311_p2 = pnand %p920_p1, %p1564_p4 }
  0x20   : > { %p1325_p3 = pneg %p1311_p2 }
  0x23   : > { %s1002_s23 = scalar_lea.hbm %s1582_s1, 256 }
  0x24   : > { %p1003_p0 = scmp.ne.s32.totalorder %s1582_s1, %s1002_s23  ;;  %p1009_p9 = scmp.lt.u32.totalorder %s1002_s23, %s1582_s1 }
  0x26   : > { %p1005_p7 = pnand %p1325_p3, %p1003_p0 }
  0x28   : > { %p1006_p8 = pneg %p1005_p7 }
  0x2a   : > { %p1011_p10 = pnand %p1009_p9, %p1006_p8 }
  0x2c   : > { %1014 = shalt.err (!%p1011_p10)
}
  0x2d   : > { %s1015_s21 = scalar_lea.vmem %s221_s17, 256  ;;  %p1023_p11 = scmp.lt.s32.totalorder %s221_s17, %s221_s17 }
  0x2e   : > { %p1016_p1 = scmp.ne.s32.totalorder %s221_s17, %s1015_s21  ;;  %p1024_p6 = scmp.lt.s32.totalorder %s1015_s21, %s1015_s21 }
  0x30   : > { %p1018_p4 = pnand %p1016_p1, %p1325_p3  ;;  %p1025_p13 = por %p1024_p6, %p1023_p11 }
  0x32   : > { %p1019_p12 = pneg %p1018_p4 }
  0x34   : > { %p1026_p5 = pnand %p1025_p13, %p1019_p12 }
  0x36   : > { %1029 = shalt.err (!%p1026_p5)
}
  0x37   : > { %s1192_s22 = smov 64   ;;  %s1193_s29 = smov 4  }
  0x38   : > { %923 = dma.hbm_to_vmem [thread:$0]  (!%p1311_p2), %s1582_s1, 256, %s221_s17, [#allocation6], %s1192_s22, %s1192_s22, %s1193_s29  }
  0x39   : > { %s1030_s10 = scalar_lea.hbm %s1559_s3, 1024 }
  0x3a   : > { %p1031_p4 = scmp.ne.s32.totalorder %s1559_s3, %s1030_s10  ;;  %p1037_p11 = scmp.lt.u32.totalorder %s1030_s10, %s1559_s3 }
  0x3c   : > { %p1033_p5 = pnand %p1031_p4, %p1325_p3 }
  0x3e   : > { %p1034_p6 = pneg %p1033_p5 }
  0x40   : > { %p1039_p12 = pnand %p1037_p11, %p1034_p6 }
  0x42   : > { %1042 = shalt.err (!%p1039_p12)
}
  0x43   : > { %s1043_s17 = scalar_lea.vmem %s1315_s20, 1024  ;;  %p1051_p8 = scmp.lt.s32.totalorder %s1315_s20, %s1315_s20 }
  0x44   : > { %p1044_p13 = scmp.ne.s32.totalorder %s1315_s20, %s1043_s17  ;;  %p1052_p9 = scmp.lt.s32.totalorder %s1043_s17, %s1043_s17 }
  0x46   : > { %p1046_p0 = pnand %p1044_p13, %p1325_p3  ;;  %p1053_p10 = por %p1052_p9, %p1051_p8 }
  0x48   : > { %p1047_p7 = pneg %p1046_p0 }
  0x4a   : > { %p1054_p1 = pnand %p1053_p10, %p1047_p7 }
  0x4c   : > { %1057 = shalt.err (!%p1054_p1)
}
  0x4d   : > { %926 = dma.hbm_to_vmem [thread:$0]  (!%p1311_p2), %s1559_s3, 1024, %s1315_s20, [#allocation6], %s1192_s22, %s1192_s22, %s1193_s29  }
  0x4e   : > { %s1194_s10 = smov [#allocation8]   ;;  %s1058_s16 = scalar_lea.hbm %s1561_s5, 1024 }
  0x4f   : > { %s252_s14 = sshll.u32 %s1194_s10, 4  ;;  %p1059_p4 = scmp.ne.s32.totalorder %s1561_s5, %s1058_s16  ;;  %s253_s14 = int_to_ptr.vmem [resolvable:$true] %s252_s14 }
  0x50   : > { %p1065_p11 = scmp.lt.u32.totalorder %s1058_s16, %s1561_s5 }
  0x51   : > { %p1061_p5 = pnand %p1059_p4, %p1325_p3 }
  0x53   : > { %p1062_p6 = pneg %p1061_p5 }
  0x55   : > { %p1067_p12 = pnand %p1065_p11, %p1062_p6 }
  0x57   : > { %1070 = shalt.err (!%p1067_p12)
}
  0x58   : > { %s1071_s20 = scalar_lea.vmem %s253_s14, 1024  ;;  %p1079_p8 = scmp.lt.s32.totalorder %s253_s14, %s253_s14 }
  0x59   : > { %p1072_p13 = scmp.ne.s32.totalorder %s253_s14, %s1071_s20  ;;  %p1080_p9 = scmp.lt.s32.totalorder %s1071_s20, %s1071_s20 }
  0x5b   : > { %p1074_p0 = pnand %p1072_p13, %p1325_p3  ;;  %p1081_p10 = por %p1080_p9, %p1079_p8 }
  0x5d   : > { %p1075_p7 = pneg %p1074_p0 }
  0x5f   : > { %p1082_p1 = pnand %p1081_p10, %p1075_p7 }
  0x61   : > { %1085 = shalt.err (!%p1082_p1)
}
  0x62   : > { %929 = dma.hbm_to_vmem [thread:$0]  (!%p1311_p2), %s1561_s5, 1024, %s253_s14, [#allocation9], %s1192_s22, %s1192_s22, %s1193_s29  }
  0x63   : > { %p790_p4 = scmp.ge.s32.totalorder %s1188_s27, 2 }
  0x64   : > { %p1584_p3 = scmp.ne.s32.totalorder (!%p790_p4), %s1575_s11, 0 }
  0x65   : > { %265 = sbr.rel (%p790_p4) target bundleno = 143 (0x8f), region = 40 }
  0x6c   : > { %268 = sbr.rel (!%p1584_p3) target bundleno = 143 (0x8f), region = 44  ;;  %s269_s9 = sand.u32 (%p1584_p3), 1, %s1184_s26  }
  0x6d   : > { %s792_s30 = sshll.u32 (%p1584_p3), %s1188_s27, 1  ;;  %s791_s18 = sshll.u32 (%p1584_p3), %s269_s9, 4 }
  0x6e   : > { %s275_s10 = ssub.s32 (%p1584_p3), 3, %s792_s30  ;;  %s1401_s29 = scalar_lea.sflag (%p1584_p3), [#allocation3], %s269_s9 }
  0x6f   : > { %p276_p5 = scmp.lt.s32.totalorder (%p1584_p3), %s275_s10, 2  ;;  %s273_s14 = scalar_lea.vmem (%p1584_p3), [#allocation2], %s791_s18 }
  0x73   : > { %s1601_s10 = smov (!%p276_p5, %s275_s10), 2 }
  0x74   : > { %s1398_s23 = sshll.u32 %s1601_s10, 7 }
  0x75   : > { %s280_s22 = ssub.s32 256, %s1398_s23 }
  0x76   : > { %281 = vsyncadd %s1401_s29, %s280_s22  ;;  %p794_p2 = scmp.ne.s32.totalorder %s1398_s23, 0  ;;  %s835_s11 = sshll.u32 %s1188_s27, 8 }
  0x77   : > { %s1409_s19 = scalar_lea.hbm %s1556_s0, %s835_s11  ;;  %s286_s21 = sshll.u32 %s273_s14, 4  ;;  %s1411_s21 = int_to_ptr.vmem [resolvable:$true] %s286_s21 }
  0x78   : > { %s1086_s17 = scalar_lea.hbm %s1409_s19, %s1398_s23  ;;  %s1090_s24 = scalar_lea.hbm %s1556_s0, 384 }
  0x79   : > { %p1087_p6 = scmp.ne.s32.totalorder %s1409_s19, %s1086_s17  ;;  %p1091_p13 = scmp.lt.u32.totalorder %s1409_s19, %s1556_s0 }
  0x7a   : > { %p1092_p0 = scmp.lt.u32.totalorder %s1090_s24, %s1086_s17  ;;  %p1094_p8 = scmp.lt.u32.totalorder %s1086_s17, %s1409_s19 }
  0x7b   : > { %p1088_p11 = pnand %p1087_p6, %p794_p2 }
  0x7c   : > { %p1093_p7 = por %p1092_p0, %p1091_p13 }
  0x7d   : > { %p1089_p12 = pneg %p1088_p11 }
  0x7e   : > { %p1095_p9 = por %p1094_p8, %p1093_p7 }
  0x80   : > { %p1096_p10 = pnand %p1095_p9, %p1089_p12 }
  0x82   : > { %1099 = shalt.err (!%p1096_p10)
}
  0x83   : > { %s1100_s18 = scalar_lea.vmem %s1411_s21, %s1398_s23  ;;  %s1195_s10 = smov [#allocation2]  }
  0x84   : > { %p1101_p1 = scmp.ne.s32.totalorder %s1411_s21, %s1100_s18  ;;  %s1104_s22 = sshll.u32 %s1195_s10, 4  ;;  %s1105_s22 = int_to_ptr.vmem [resolvable:$false] %s1104_s22 }
  0x85   : > { %s1106_s14 = scalar_lea.vmem %s1105_s22, 512  ;;  %p1107_p6 = scmp.lt.s32.totalorder %s1411_s21, %s1105_s22 }
  0x86   : > { %p1102_p3 = pnand %p1101_p1, %p794_p2  ;;  %p1108_p11 = scmp.lt.s32.totalorder %s1106_s14, %s1100_s18 }
  0x88   : > { %p1103_p5 = pneg %p1102_p3  ;;  %p1109_p13 = por %p1108_p11, %p1107_p6 }
  0x8a   : > { %p1110_p0 = pnand %p1109_p13, %p1103_p5 }
  0x8c   : > { %1113 = shalt.err (!%p1110_p0)
}
  0x8d   : > { %s1196_s11 = smov 128   ;;  %s1197_s8 = smov 8  }
  0x8e   : > { %292 = dma.hbm_to_vmem [thread:$0]  (%p794_p2), %s1409_s19, %s1398_s23, %s1411_s21, %s1401_s29, %s1196_s11, %s1196_s11, %s1197_s8  }
  0x8f PF: > { %p1585_p12 = scmp.ne.s32.totalorder %s1580_s15, 0 }
  0x90   : > { %s1441_s16 = sand.u32 (!%p1585_p12), 1, %s1180_s25   ;;  %p1586_p7 = scmp.ne.s32.totalorder (!%p1585_p12), %s1576_s12, 0 }
  0x91   : > { %298 = sbr.rel (%p1585_p12) target bundleno = 856 (0x358), region = 48  ;;  %s799_s17 = sshll.u32 (!%p1585_p12), %s1441_s16, 4 }
  0x92   : > { %s301_s20 = scalar_lea.sflag (!%p1585_p12), [#allocation3], %s1441_s16  ;;  %s304_s1 = scalar_lea.vmem (!%p1585_p12), [#allocation2], %s799_s17 }
  0x98   : > { %1159 = dma.done.wait (%p1586_p7), %s301_s20, 256  }
  0x99   : > { %1161 = vsyncadd (%p1586_p7), %s301_s20, 4294967040  ;;  %p1587_p2 = scmp.eq.s32.totalorder %s1264_s28, 0 }
  0x9b   : > { %1163 = dma.done.wait (%p1587_p2), [#allocation6], 1280   ;;  %p1588_p8 = pmov %p1587_p2 }
  0x9c   : > { %p1589_p9 = pmov %p1587_p2 }
  0x9d   : > { %1165 = vsyncadd (%p1588_p8), [#allocation6], 4294966016 }
  0x9e   : > { %1167 = dma.done.wait (%p1589_p9), [#allocation9], 1024   ;;  %p1590_p10 = pmov %p1587_p2 }
  0x9f   : > { %v1198_v0 = vmov 0.0   ;;  %vm1199_vm0 = vmmov 0   ;;  %v984_v1 = vld [vmem:[#allocation5] sm:$0xff]   ;;  %v985_v2 = vld [vmem:[#allocation5 + $0x8] sm:$0xff]   ;;  %v986_v5 = vld [vmem:[#allocation7] sm:$0xff]   ;;  %vm384_vm1 = vcmask 261120  }
  0xa0   : > { %1169 = vsyncadd (%p1590_p10), [#allocation9], 4294966272  ;;  %858 = vmatprep.subr.bf16.mxu0 %v1198_v0  ;;  %862 = vmatprep.mubr.msk.bf16.mxu0 %vm1199_vm0, %v1198_v0  ;;  %v358_v3 = vld [vmem:[%s304_s1] sm:$0xff]  ;;  %v359_v4 = vld [vmem:[%s304_s1 + $0x8] sm:$0xff]  ;;  %s346_s24 = scalar_lea.vmem [#allocation10], %s799_s17  ;;  %s664_s9 = scalar_lea.sflag [#allocation4], %s1441_s16 }
  0xa1   : > { %866 = vmatprep.subr.bf16.mxu1 %v1198_v0  ;;  %882 = vmatprep.mubr.msk.bf16.mxu1 %vm1199_vm0, %v1198_v0  ;;  %v360_v6 = vpack.c.bf16 %v359_v4, %v358_v3  ;;  %v987_v7 = vld [vmem:[#allocation7 + $0x8] sm:$0xff]   ;;  %v988_v8 = vld [vmem:[#allocation7 + $0x10] sm:$0xff]   ;;  %v989_v9 = vld [vmem:[#allocation7 + $0x18] sm:$0xff]   ;;  %p1591_p1 = scmp.ne.s32.totalorder %s1577_s13, 0 }
  0xa2   : > { %859 = vmatpush3.bf16.msra.mxu0 %v984_v1  ;;  %867 = vmatpush3.bf16.msra.mxu1 %v986_v5  ;;  %v990_v10 = vld [vmem:[#allocation7 + $0x20] sm:$0xff]   ;;  %v991_v11 = vld [vmem:[#allocation7 + $0x28] sm:$0xff]   ;;  %v992_v12 = vld [vmem:[#allocation7 + $0x30] sm:$0xff]   ;;  %s827_s30 = sshll.u32 (%p1591_p1), %s1264_s28, 1 }
  0xa3   : > { %860 = vmatprep.subr.bf16.mxu0 %v1198_v0  ;;  %868 = vmatprep.subr.bf16.mxu1 %v1198_v0  ;;  %v993_v13 = vld [vmem:[#allocation7 + $0x38] sm:$0xff]   ;;  %v994_v14 = vld [vmem:[#allocation8] sm:$0xff]   ;;  %v995_v15 = vld [vmem:[#allocation8 + $0x8] sm:$0xff]   ;;  %s672_s18 = ssub.s32 (%p1591_p1), 3, %s827_s30 }
  0xa4   : > { %v996_v16 = vld [vmem:[#allocation8 + $0x10] sm:$0xff]   ;;  %v997_v17 = vld [vmem:[#allocation8 + $0x18] sm:$0xff]   ;;  %v998_v18 = vld [vmem:[#allocation8 + $0x20] sm:$0xff]   ;;  %p673_p3 = scmp.lt.s32.totalorder (%p1591_p1), %s672_s18, 2 }
  0xa5   : > { %v999_v19 = vld [vmem:[#allocation8 + $0x28] sm:$0xff]   ;;  %v804_v20 = vld [vmem:[%s1558_s2] ss:$0 sm:$0xff]  ;;  %v1001_v31 = vld [vmem:[#allocation8 + $0x38] sm:$0xff]  }
  0xa6   : > { %861 = vmatpush3.bf16.msra.mxu0 %v985_v2  ;;  %869 = vmatpush3.bf16.msra.mxu1 %v987_v7  ;;  %v1000_v30 = vld [vmem:[#allocation8 + $0x30] sm:$0xff]  }
  0xa7   : > { %886 = vmatprep.subr.bf16.mxu0 %v1198_v0  ;;  %870 = vmatprep.subr.bf16.mxu1 %v1198_v0  ;;  %v808_v32 = vld [vmem:[%s1560_s4] ss:$0 sm:$0xff] }
  0xa8   : > { %v817_v42 = vld [vmem:[%s1562_s6] ss:$0 sm:$0xff] }
  0xa9   : > { %863 = vmatmul.mubr.msk.bf16.vlgmr.msra.gmra.mrb[0].mxu0 %vm384_vm1, %v360_v6 }
  0xaa   : > { %902 = vmatprep.mubr.msk.bf16.mxu0 %vm1199_vm0, %v1198_v0  ;;  %871 = vmatpush3.bf16.msra.mxu1 %v988_v8 }
  0xab   : > { %872 = vmatprep.subr.bf16.mxu1 %v1198_v0  ;;  %887 = vmatpush3.bf16.msra.mxu0 %v994_v14 }
  0xac   : > { %888 = vmatprep.subr.bf16.mxu0 %v1198_v0 }
  0xae   : > { %873 = vmatpush3.bf16.msra.mxu1 %v989_v9 }
  0xaf   : > { %874 = vmatprep.subr.bf16.mxu1 %v1198_v0  ;;  %889 = vmatpush3.bf16.msra.mxu0 %v995_v15 }
  0xb0   : > { %890 = vmatprep.subr.bf16.mxu0 %v1198_v0 }
  0xb2   : > { %875 = vmatpush3.bf16.msra.mxu1 %v990_v10 }
  0xb3   : > { %876 = vmatprep.subr.bf16.mxu1 %v1198_v0  ;;  %891 = vmatpush3.bf16.msra.mxu0 %v996_v16 }
  0xb4   : > { %892 = vmatprep.subr.bf16.mxu0 %v1198_v0 }
  0xb6   : > { %877 = vmatpush3.bf16.msra.mxu1 %v991_v11 }
  0xb7   : > { %878 = vmatprep.subr.bf16.mxu1 %v1198_v0  ;;  %893 = vmatpush3.bf16.msra.mxu0 %v997_v17 }
  0xb8   : > { %894 = vmatprep.subr.bf16.mxu0 %v1198_v0 }
  0xba   : > { %879 = vmatpush3.bf16.msra.mxu1 %v992_v12 }
  0xbb   : > { %880 = vmatprep.subr.bf16.mxu1 %v1198_v0  ;;  %895 = vmatpush3.bf16.msra.mxu0 %v998_v18 }
  0xbc   : > { %896 = vmatprep.subr.bf16.mxu0 %v1198_v0 }
  0xbe   : > { %881 = vmatpush3.bf16.msra.mxu1 %v993_v13 }
  0xbf   : > { %897 = vmatpush3.bf16.msra.mxu0 %v999_v19 }
  0xc0   : > { %898 = vmatprep.subr.bf16.mxu0 %v1198_v0 }
  0xc3   : > { %899 = vmatpush3.bf16.msra.mxu0 %v1000_v30 }
  0xc4   : > { %900 = vmatprep.subr.bf16.mxu0 %v1198_v0 }
  0xc7   : > { %901 = vmatpush3.bf16.msra.mxu0 %v1001_v31 }
 0x17c   : > { %v422_v21 = vpop.f32.mrb[0].mxu0 }
 0x17d   : > { %v423_v22 = vadd.f32 %v804_v20, %v422_v21  ;;  %v864_v23 = vpop.f32.mrb[1].mxu0 }
 0x17e   : > { %v425_v24 = vpop.f32.mrb[2].mxu0 }
 0x17f   : > { %v426_v25 = vadd.f32 %v804_v20, %v425_v24  ;;  %v865_v26 = vpop.f32.mrb[3].mxu0  ;;  %v429_v27 = vmax.f32 %v423_v22, 0.0 }
 0x181   : > { %v430_v28 = vmax.f32 %v426_v25, 0.0 }
 0x183   : > { %v431_v29 = vpack.c.bf16 %v430_v28, %v429_v27 }
 0x185   : > { %883 = vmatmul.mubr.bf16.vlgmr.msra.gmra.mrb[0].mxu1 %v431_v29 }
 0x258   : > { %v537_v33 = vpop.f32.mrb[0].mxu1 }
 0x259   : > { %v538_v34 = vadd.f32 %v808_v32, %v537_v33  ;;  %v884_v35 = vpop.f32.mrb[1].mxu1 }
 0x25a   : > { %v540_v36 = vpop.f32.mrb[2].mxu1 }
 0x25b   : > { %v541_v37 = vadd.f32 %v808_v32, %v540_v36  ;;  %v885_v38 = vpop.f32.mrb[3].mxu1  ;;  %v544_v39 = vmax.f32 %v538_v34, 0.0 }
 0x25d   : > { %v545_v40 = vmax.f32 %v541_v37, 0.0 }
 0x25f   : > { %v546_v41 = vpack.c.bf16 %v545_v40, %v544_v39 }
 0x261   : > { %903 = vmatmul.mubr.bf16.vlgmr.msra.gmra.mrb[4].mxu0 %v546_v41 }
 0x334   : > { %v652_v43 = vpop.f32.mrb[4].mxu0 }
 0x335   : > { %v653_v44 = vadd.f32 %v817_v42, %v652_v43  ;;  %v904_v45 = vpop.f32.mrb[5].mxu0  ;;  %670 = sbr.rel (!%p1591_p1) target bundleno = 856 (0x358), region = 68 }
 0x336   : > { %v655_v46 = vpop.f32.mrb[6].mxu0 }
 0x337   : > { %v659_v47 = vmax.f32 %v653_v44, 0.0  ;;  %v656_v48 = vadd.f32 %v817_v42, %v655_v46  ;;  %v905_v49 = vpop.f32.mrb[7].mxu0 }
 0x339   : > { %661 = vst [vmem:[%s346_s24] sm:$0xff] %v659_v47  ;;  %v660_v50 = vmax.f32 %v656_v48, 0.0 }
 0x33b   : > { %662 = vst [vmem:[%s346_s24 + $0x8] sm:$0xff] %v660_v50 }
 0x33c   : > { %s1603_s18 = smov (!%p673_p3, %s672_s18), 2 }
 0x33d   : > { %s1498_s10 = sshll.u32 %s1603_s18, 7 }
 0x33e   : > { %s677_s22 = ssub.s32 256, %s1498_s10 }
 0x33f   : > { %678 = vsyncadd %s664_s9, %s677_s22  ;;  %p829_p5 = scmp.ne.s32.totalorder %s1498_s10, 0  ;;  %s836_s14 = sshll.u32 %s1264_s28, 8 }
 0x340   : > { %s1508_s8 = scalar_lea.hbm %s1563_s7, %s836_s14  ;;  %s683_s17 = sshll.u32 %s346_s24, 4  ;;  %s1510_s17 = int_to_ptr.vmem [resolvable:$true] %s683_s17 }
 0x341   : > { %s1114_s20 = scalar_lea.vmem %s1510_s17, %s1498_s10  ;;  %s1200_s1 = smov [#allocation10]  }
 0x342   : > { %p1115_p6 = scmp.ne.s32.totalorder %s1510_s17, %s1114_s20  ;;  %s1118_s12 = sshll.u32 %s1200_s1, 4  ;;  %s1119_s12 = int_to_ptr.vmem [resolvable:$false] %s1118_s12 }
 0x343   : > { %s1120_s28 = scalar_lea.vmem %s1119_s12, 512  ;;  %p1121_p0 = scmp.lt.s32.totalorder %s1510_s17, %s1119_s12 }
 0x344   : > { %p1116_p11 = pnand %p1115_p6, %p829_p5  ;;  %p1122_p12 = scmp.lt.s32.totalorder %s1120_s28, %s1114_s20 }
 0x346   : > { %p1117_p13 = pneg %p1116_p11  ;;  %p1123_p7 = por %p1122_p12, %p1121_p0 }
 0x348   : > { %p1124_p2 = pnand %p1123_p7, %p1117_p13 }
 0x34a   : > { %1127 = shalt.err (!%p1124_p2)
}
 0x34b   : > { %s1128_s15 = scalar_lea.hbm %s1508_s8, %s1498_s10  ;;  %s1132_s19 = scalar_lea.hbm %s1563_s7, 384 }
 0x34c   : > { %p1129_p8 = scmp.ne.s32.totalorder %s1508_s8, %s1128_s15  ;;  %p1133_p1 = scmp.lt.u32.totalorder %s1508_s8, %s1563_s7 }
 0x34d   : > { %p1134_p3 = scmp.lt.u32.totalorder %s1132_s19, %s1128_s15  ;;  %p1136_p11 = scmp.lt.u32.totalorder %s1128_s15, %s1508_s8 }
 0x34e   : > { %p1130_p9 = pnand %p1129_p8, %p829_p5 }
 0x34f   : > { %p1135_p6 = por %p1134_p3, %p1133_p1 }
 0x350   : > { %p1131_p10 = pneg %p1130_p9 }
 0x351   : > { %p1137_p13 = por %p1136_p11, %p1135_p6 }
 0x353   : > { %p1138_p0 = pnand %p1137_p13, %p1131_p10 }
 0x355   : > { %1141 = shalt.err (!%p1138_p0)
}
 0x356   : > { %s1201_s30 = smov 128   ;;  %s1202_s18 = smov 8  }
 0x357   : > { %689 = dma.vmem_to_hbm [thread:$0]  (%p829_p5), %s1510_s17, %s1498_s10, %s1508_s8, %s664_s9, %s1201_s30, %s1201_s30, %s1202_s18  }
 0x358 PF: > { %s1592_s22 = sld [smem:[#allocation15_spill]]  ;;  %s1593_s14 = sld [smem:[#allocation18_spill]] }
 0x35e   : > { %s698_s13 = sand.u32 1, %s1592_s22   ;;  %p1594_p12 = scmp.ne.s32.totalorder %s1593_s14, 0 }
 0x35f   : > { %s699_s11 = scalar_lea.sflag [#allocation4], %s698_s13 }
 0x360   : > { %p931_p7 = pnand %p790_p4, %p1594_p12 }
 0x362   : > { %1171 = dma.done.wait (!%p931_p7), %s699_s11, 256  }
 0x363   : > { %1173 = vsyncadd (!%p931_p7), %s699_s11, 4294967040  ;;  %s1595_s27 = sld [smem:[#allocation16_spill]]  ;;  %s1596_s20 = sld [smem:[#allocation17_spill]] }
 0x364   : > { %s1597_s24 = smov %s1180_s25  ;;  %s1598_s25 = smov %s1184_s26 }
 0x369   : > { %p22_p2 = scmp.ge.s32.totalorder %s1595_s27, 4   ;;  %s1599_s26 = smov %s1596_s20 }
 0x36b   :  { %24 = sbr.rel (!%p22_p2) target bundleno = 9 (0x9), region = 105 }
 0x372   :  { %704 = vsyncpa [#allocation3], 1 }
 0x373   :  { %706 = vsyncpa [#allocation3 + $0x1], 1 }
 0x374   :  { %707 = vsyncpa [#allocation6], 1 }
 0x375   :  { %708 = vsyncpa [#allocation9], 1 }
 0x376   :  { %709 = vsyncpa [#allocation4], 1 }
 0x377   :  { %711 = vsyncpa [#allocation4 + $0x1], 1 }

</bundles_post_ra>
